<compile_context>
chip_gen: v6e
topology: v6e:2x2x1
jax: 0.10.0
libtpu: 0.0.40
codegen_flags: <defaults>
</compile_context>

<pallas_src>
import jax
import jax.numpy as jnp
from jax.experimental import pallas as pl
from jax.experimental.pallas import tpu as pltpu


_LANE = 128
_MAX_TILE_ROWS = 2048      # kernel rows per grid step (folded rows when folding)
_SPLIT_MIN_ROWS = 1024     # if total kernel rows >= 2*this, keep >=2 grid steps (v7x: 2 TCs)


def _round_up(a, m):
    return (a + m - 1) // m * m


def final_layer_kernel(x_ref, y_ref, t_ref, w_ref, b_ref, o_ref):
    """out = [x | y | t] @ W + b.

    The concat is fused: three partial MXU dots against static row-slices of the
    resident weight, accumulated in f32.  Bias is added once from a resident
    (1, od) f32 block.  Works for both the folded (lane-dense) and plain layouts.
    """
    kb = x_ref.shape[1]
    w = w_ref[...]  # resident weight; static slices below are zero-cost views
    acc = jnp.dot(x_ref[...], w[0:kb, :], preferred_element_type=jnp.float32)
    acc += jnp.dot(y_ref[...], w[kb:2 * kb, :], preferred_element_type=jnp.float32)
    acc += jnp.dot(t_ref[...], w[2 * kb:3 * kb, :], preferred_element_type=jnp.float32)
    o_ref[...] = (acc + b_ref[...]).astype(o_ref.dtype)


def _vmem_capacity_bytes():
    try:
        return int(pltpu.get_tpu_info().vmem_capacity_bytes)
    except Exception:
        return 64 << 20  # conservative fallback (v7x per-core physical VMEM)


def _choose_tile_rows(n_rows, kb, od, in_itemsize, out_itemsize, w_itemsize, budget):
    """Largest kernel-row tile whose PADDED double-buffered footprint fits `budget`."""
    lanes_in = _round_up(kb, _LANE)
    lanes_out = _round_up(od, _LANE)
    sub_in = max(8, 32 // in_itemsize)  # sublane multiple for the compute dtype
    # Resident weight + bias (counted double-buffered to be conservative).
    resident = 2 * (_round_up(3 * kb, 8) * lanes_out * w_itemsize + 8 * lanes_out * 4)
    # Per kernel-row bytes: double-buffered x/y/t input tiles + output tile (lane padded).
    per_row = 2 * (3 * lanes_in * in_itemsize + lanes_out * out_itemsize)
    cap = max(sub_in, (budget - resident) // max(per_row, 1))
    tm = min(_MAX_TILE_ROWS, n_rows, cap)
    # Keep >=2 grid steps for large problems so v7x's two TensorCores both get work.
    if n_rows >= 2 * _SPLIT_MIN_ROWS:
        tm = min(tm, _round_up(pl.cdiv(n_rows, 2), sub_in))
    if tm < n_rows:
        tm = max(sub_in, (tm // sub_in) * sub_in)
    return tm


def final_layer(x, t, y, w, b, *, tm=None):
    """Pallas equivalent of FinalLayer.forward(x, t, y).

    x, t, y : (N, hidden)  activations.  Pass them (and w) pre-cast to bf16 if you
              want narrow HBM traffic; the wrapper does NOT cast (anti-pattern).
    w       : (3*hidden, out_dim)  -- torch weight (out_dim, 3*hidden) transposed
    b       : (out_dim,)
    tm      : optional row-tile override, in ORIGINAL rows
    returns : (N, out_dim) in x's dtype
    """
    N, h = x.shape
    K, out_dim = w.shape
    assert K == 3 * h, "weight must be (3*hidden, out_dim)"
    out_dtype = x.dtype

    # --- Lane-dense folding: fold `fold` consecutive rows into one 128-lane row. ---
    fold = _LANE // h if (h <= _LANE and _LANE % h == 0) else 1
    if fold > 1 and N % fold != 0:
        fold = 1  # TODO(synk): pad N to a multiple of fold instead of falling back.

    if fold > 1:
        n_rows, kb, od = N // fold, fold * h, fold * out_dim
        x_in = x.reshape(n_rows, kb)   # free metadata reshape (row-major)
        y_in = y.reshape(n_rows, kb)
        t_in = t.reshape(n_rows, kb)
        # Block-diagonal folded weight (concat order x, y, t); tiny one-time op.
        eye = jnp.eye(fold, dtype=w.dtype)
        w_in = jnp.concatenate(
            [jnp.kron(eye, w[i * h:(i + 1) * h, :]) for i in range(3)], axis=0)
        b_in = jnp.tile(b.astype(jnp.float32), fold).reshape(1, od)
    else:
        n_rows, kb, od = N, h, out_dim
        x_in, y_in, t_in = x, y, t
        w_in = w
        b_in = b.astype(jnp.float32).reshape(1, od)

    in_itemsize = jnp.dtype(x_in.dtype).itemsize
    w_itemsize = jnp.dtype(w_in.dtype).itemsize
    out_itemsize = jnp.dtype(out_dtype).itemsize

    vmem_cap = _vmem_capacity_bytes()
    budget = max(32 << 20, vmem_cap - (24 << 20))  # ~104 MiB v5e/v6e, ~40 MiB v7x

    if tm is None:
        tm_rows = _choose_tile_rows(n_rows, kb, od, in_itemsize, out_itemsize,
                                    w_itemsize, budget)
    else:
        sub = max(8, 32 // in_itemsize)
        tm_rows = min(max(1, tm // fold), n_rows)
        if tm_rows < n_rows:
            tm_rows = max(sub, (tm_rows // sub) * sub)

    grid = (pl.cdiv(n_rows, tm_rows),)

    # Padded-layout VMEM estimate (last dim pads to 128 lanes).
    lanes_in = _round_up(kb, _LANE)
    lanes_out = _round_up(od, _LANE)
    vmem_est = (2 * (_round_up(3 * kb, 8) * lanes_out * w_itemsize + 8 * lanes_out * 4)
                + 2 * tm_rows * (3 * lanes_in * in_itemsize + lanes_out * out_itemsize))
    vmem_limit = int(min(max(vmem_est + (4 << 20), 32 << 20), vmem_cap - (8 << 20)))

    cost = pl.CostEstimate(
        flops=2 * n_rows * (3 * kb) * od,
        transcendentals=0,
        bytes_accessed=(3 * n_rows * kb * in_itemsize
                        + n_rows * od * out_itemsize
                        + 3 * kb * od * w_itemsize
                        + od * 4),
    )

    act_spec = pl.BlockSpec((tm_rows, kb), lambda i: (i, 0))
    out_f = pl.pallas_call(
        final_layer_kernel,
        out_shape=jax.ShapeDtypeStruct((n_rows, od), out_dtype),
        grid=grid,
        in_specs=[
            act_spec,                                       # x tile (pipelined over rows)
            act_spec,                                       # y tile
            act_spec,                                       # t tile
            pl.BlockSpec((3 * kb, od), lambda i: (0, 0)),   # weight, resident in VMEM
            pl.BlockSpec((1, od), lambda i: (0, 0)),        # bias (f32), resident in VMEM
        ],
        out_specs=pl.BlockSpec((tm_rows, od), lambda i: (i, 0)),
        compiler_params=pltpu.CompilerParams(
            dimension_semantics=("parallel",),
            vmem_limit_bytes=vmem_limit,
        ),
        cost_estimate=cost,
    )(x_in, y_in, t_in, w_in, b_in)

    return out_f.reshape(N, out_dim) if fold > 1 else out_f


if __name__ == "__main__":
    key = jax.random.PRNGKey(0)
    hidden = 32          # hidden_size (d)
    input_channels = 3   # x, y, t concatenated
    out_dim = 32
    in_features = input_channels * hidden

    kx, kt, ky, kw, kb_ = jax.random.split(key, 5)

    # Deterministic init mimicking torch.nn.Linear default (uniform +-1/sqrt(in)).
    bound = 1.0 / jnp.sqrt(jnp.float32(in_features))
    w_torch = jax.random.uniform(kw, (out_dim, in_features), jnp.float32, -bound, bound)
    b = jax.random.uniform(kb_, (out_dim,), jnp.float32, -bound, bound)
    w = w_torch.T  # (in_features, out_dim) for the kernel

    def ref(x, t, y):
        # PyTorch concat order is (x, y, t).
        return jnp.concatenate([x, y, t], axis=1) @ w + b

    ok = True

    # Case 1: toy shape, single grid step (folded to (2, 128) lane-dense rows).
    N = 8
    x = jax.random.normal(kx, (N, hidden), dtype=jnp.float32)
    t = jax.random.normal(kt, (N, hidden), dtype=jnp.float32)
    y = jax.random.normal(ky, (N, hidden), dtype=jnp.float32)
    out = jax.block_until_ready(final_layer(x, t, y, w, b))
    assert out.shape == (N, out_dim)
    ok &= bool(jnp.allclose(out, ref(x, t, y), atol=1e-5, rtol=1e-5))

    # Case 2: multi-step 1-D grid over rows (pipelined lane-dense tiles + resident weight).
    N = 256
    kx2, kt2, ky2 = jax.random.split(jax.random.PRNGKey(1), 3)
    x = jax.random.normal(kx2, (N, hidden), dtype=jnp.float32)
    t = jax.random.normal(kt2, (N, hidden), dtype=jnp.float32)
    y = jax.random.normal(ky2, (N, hidden), dtype=jnp.float32)
    out = jax.block_until_ready(final_layer(x, t, y, w, b, tm=64))
    ok &= bool(jnp.allclose(out, ref(x, t, y), atol=1e-5, rtol=1e-5))

    # Case 3: ragged rows (last block partially filled) — exercises edge masking.
    N = 200
    kx3, kt3, ky3 = jax.random.split(jax.random.PRNGKey(2), 3)
    x = jax.random.normal(kx3, (N, hidden), dtype=jnp.float32)
    t = jax.random.normal(kt3, (N, hidden), dtype=jnp.float32)
    y = jax.random.normal(ky3, (N, hidden), dtype=jnp.float32)
    out = jax.block_until_ready(final_layer(x, t, y, w, b, tm=64))
    ok &= bool(jnp.allclose(out, ref(x, t, y), atol=1e-5, rtol=1e-5))

    # Case 4: caller passes bf16 activations/weight (no wrapper-side cast); f32 accumulation.
    xb, tb, yb = (a.astype(jnp.bfloat16) for a in (x, t, y))
    wb = w.astype(jnp.bfloat16)
    out_bf16 = jax.block_until_ready(final_layer(xb, tb, yb, wb, b))
    ok &= bool(jnp.allclose(out_bf16.astype(jnp.float32), ref(x, t, y),
                            atol=5e-2, rtol=5e-2))

    assert ok, "mismatch vs reference"
    print("KERNEL_OK")
</pallas_src>

<mosaic_0001>
module attributes {stable_mosaic.version = 11 : i64} {
  func.func @final_layer_kernel(%arg0: i32, %arg1: memref<2x128xf32, #tpu.memory_space<vmem>>, %arg2: memref<2x128xf32, #tpu.memory_space<vmem>>, %arg3: memref<2x128xf32, #tpu.memory_space<vmem>>, %arg4: memref<384x128xf32, #tpu.memory_space<vmem>>, %arg5: memref<1x128xf32, #tpu.memory_space<vmem>>, %arg6: memref<2x128xf32, #tpu.memory_space<vmem>>) attributes {dimension_semantics = [#tpu.dimension_semantics<parallel>], iteration_bounds = array<i64: 1>, scalar_prefetch = 0 : i64, scratch_operands = 0 : i64, tpu.core_type = #tpu.core_type<tc>, window_params = [{transform_indices = @transform_0, window_bounds = array<i64: 2, 128>}, {transform_indices = @transform_1, window_bounds = array<i64: 2, 128>}, {transform_indices = @transform_2, window_bounds = array<i64: 2, 128>}, {pipeline_mode = #tpu.pipeline_mode<synchronous>, transform_indices = @transform_3, window_bounds = array<i64: 384, 128>}, {pipeline_mode = #tpu.pipeline_mode<synchronous>, transform_indices = @transform_4, window_bounds = array<i64: 1, 128>}, {transform_indices = @transform_5, window_bounds = array<i64: 2, 128>}]} {
    %c0 = arith.constant 0 : index
    %c0_0 = arith.constant 0 : index
    %0 = vector.load %arg4[%c0, %c0_0] : memref<384x128xf32, #tpu.memory_space<vmem>>, vector<384x128xf32>
    %c0_1 = arith.constant 0 : index
    %c0_2 = arith.constant 0 : index
    %1 = vector.load %arg1[%c0_1, %c0_2] : memref<2x128xf32, #tpu.memory_space<vmem>>, vector<2x128xf32>
    %2 = vector.extract_strided_slice %0 {offsets = [0, 0], sizes = [128, 128], strides = [1, 1]} : vector<384x128xf32> to vector<128x128xf32>
    %cst = arith.constant dense<0.000000e+00> : vector<2x128xf32>
    %3 = tpu.matmul %1, %2, %cst {dimension_numbers = #tpu.dot_dimension_numbers<[1], [0], [0], [1], [0, 0, 1, 1], [], []>} : vector<2x128xf32>, vector<128x128xf32>, vector<2x128xf32> -> vector<2x128xf32>
    %c0_3 = arith.constant 0 : index
    %c0_4 = arith.constant 0 : index
    %4 = vector.load %arg2[%c0_3, %c0_4] : memref<2x128xf32, #tpu.memory_space<vmem>>, vector<2x128xf32>
    %5 = vector.extract_strided_slice %0 {offsets = [128, 0], sizes = [128, 128], strides = [1, 1]} : vector<384x128xf32> to vector<128x128xf32>
    %cst_5 = arith.constant dense<0.000000e+00> : vector<2x128xf32>
    %6 = tpu.matmul %4, %5, %cst_5 {dimension_numbers = #tpu.dot_dimension_numbers<[1], [0], [0], [1], [0, 0, 1, 1], [], []>} : vector<2x128xf32>, vector<128x128xf32>, vector<2x128xf32> -> vector<2x128xf32>
    %7 = arith.addf %3, %6 : vector<2x128xf32>
    %c0_6 = arith.constant 0 : index
    %c0_7 = arith.constant 0 : index
    %8 = vector.load %arg3[%c0_6, %c0_7] : memref<2x128xf32, #tpu.memory_space<vmem>>, vector<2x128xf32>
    %9 = vector.extract_strided_slice %0 {offsets = [256, 0], sizes = [128, 128], strides = [1, 1]} : vector<384x128xf32> to vector<128x128xf32>
    %cst_8 = arith.constant dense<0.000000e+00> : vector<2x128xf32>
    %10 = tpu.matmul %8, %9, %cst_8 {dimension_numbers = #tpu.dot_dimension_numbers<[1], [0], [0], [1], [0, 0, 1, 1], [], []>} : vector<2x128xf32>, vector<128x128xf32>, vector<2x128xf32> -> vector<2x128xf32>
    %11 = arith.addf %7, %10 : vector<2x128xf32>
    %c0_9 = arith.constant 0 : index
    %c0_10 = arith.constant 0 : index
    %12 = vector.load %arg5[%c0_9, %c0_10] : memref<1x128xf32, #tpu.memory_space<vmem>>, vector<1x128xf32>
    %13 = vector.broadcast %12 : vector<1x128xf32> to vector<2x128xf32>
    %14 = arith.addf %11, %13 : vector<2x128xf32>
    %c0_11 = arith.constant 0 : index
    %c0_12 = arith.constant 0 : index
    %15 = vector.load %arg6[%c0_11, %c0_12] : memref<2x128xf32, #tpu.memory_space<vmem>>, vector<2x128xf32>
    tpu.vector_store %arg6[%c0_11, %c0_12], %14 {strides = array<i32>} : memref<2x128xf32, #tpu.memory_space<vmem>>, vector<2x128xf32>,
    return
  }
  func.func @transform_0(%arg0: i32) -> (i32, i32) {
    %c0_i32 = arith.constant 0 : i32
    %c0_i32_0 = arith.constant 0 : i32
    return %arg0, %c0_i32 : i32, i32
  }
  func.func @transform_1(%arg0: i32) -> (i32, i32) {
    %c0_i32 = arith.constant 0 : i32
    %c0_i32_0 = arith.constant 0 : i32
    return %arg0, %c0_i32 : i32, i32
  }
  func.func @transform_2(%arg0: i32) -> (i32, i32) {
    %c0_i32 = arith.constant 0 : i32
    %c0_i32_0 = arith.constant 0 : i32
    return %arg0, %c0_i32 : i32, i32
  }
  func.func @transform_3(%arg0: i32) -> (i32, i32) {
    %c0_i32 = arith.constant 0 : i32
    %c0_i32_0 = arith.constant 0 : i32
    %c0_i32_1 = arith.constant 0 : i32
    return %c0_i32, %c0_i32_0 : i32, i32
  }
  func.func @transform_4(%arg0: i32) -> (i32, i32) {
    %c0_i32 = arith.constant 0 : i32
    %c0_i32_0 = arith.constant 0 : i32
    %c0_i32_1 = arith.constant 0 : i32
    return %c0_i32, %c0_i32_0 : i32, i32
  }
  func.func @transform_5(%arg0: i32) -> (i32, i32) {
    %c0_i32 = arith.constant 0 : i32
    %c0_i32_0 = arith.constant 0 : i32
    return %arg0, %c0_i32 : i32, i32
  }
}

</mosaic_0001>

<bundles_post_ra>
// kernel: tpu_custom_call.1
= control target key start
LH: loop header
LB: loop body
LE: loop exit
PB: predicated region body
PF: predicated region fallthrough
CT: control target
= control target key end

     0   :  { %10 = vsyncpa [#allocation3], 0  ;;  %s706_s0 = inlined_call_operand.hbm [shape: f32[2,128], index: 0, kind: input, shape index: {}]   ;;  %s707_s1 = inlined_call_operand.hbm [shape: f32[2,128], index: 1, kind: input, shape index: {}]   ;;  %s708_s2 = inlined_call_operand.vmem [shape: f32[2,128], index: 2, kind: input, shape index: {}]   ;;  %s709_s3 = inlined_call_operand.hbm [shape: f32[384,128], index: 3, kind: input, shape index: {}]   ;;  %s710_s4 = inlined_call_operand.vmem [shape: f32[1,128], index: 4, kind: input, shape index: {}]   ;;  %s711_s5 = inlined_call_operand.hbm [shape: f32[2,128], index: 5, kind: output, shape index: {}]  }
   0x1   :  { %11 = vsyncpa [#allocation6], 0 }
   0x2   :  { %12 = vsyncpa [#allocation4], 0  ;;  %s596_s18 = smov [#allocation5]   ;;  %s597_s20 = smov [#allocation2]  }
   0x3   :  { %s29_s19 = sshll.u32 %s596_s18, 4  ;;  %s19_s21 = sshll.u32 %s597_s20, 4  ;;  %s30_s19 = int_to_ptr.vmem [resolvable:$true] %s29_s19  ;;  %s20_s21 = int_to_ptr.vmem [resolvable:$true] %s19_s21 }
   0x4   :  { %s518_s22 = scalar_lea.vmem %s30_s19, 32  ;;  %p523_p1 = scmp.lt.s32.totalorder %s30_s19, %s30_s19 }
   0x5   :  { %p519_p0 = scmp.ne.s32.totalorder %s30_s19, %s518_s22  ;;  %p524_p2 = scmp.lt.s32.totalorder %s518_s22, %s518_s22 }
   0x7   :  { %p525_p3 = por %p524_p2, %p523_p1 }
   0x9   :  { %p526_p4 = pnand %p525_p3, %p519_p0 }
   0xb   :  { %529 = shalt.err (!%p526_p4)
}
   0xc   :  { %32 = dma.hbm_to_vmem [thread:$0]  %s707_s1, 32, %s30_s19, [#allocation6]  }
   0xd   :  { %s538_s25 = scalar_lea.vmem %s20_s21, 32  ;;  %p543_p6 = scmp.lt.s32.totalorder %s20_s21, %s20_s21 }
   0xe   :  { %p539_p5 = scmp.ne.s32.totalorder %s20_s21, %s538_s25  ;;  %p544_p7 = scmp.lt.s32.totalorder %s538_s25, %s538_s25 }
  0x10   :  { %p545_p8 = por %p544_p7, %p543_p6 }
  0x12   :  { %p546_p9 = pnand %p545_p8, %p539_p5 }
  0x14   :  { %549 = shalt.err (!%p546_p9)
}
  0x15   :  { %22 = dma.hbm_to_vmem [thread:$0]  %s706_s0, 32, %s20_s21, [#allocation3]  }
  0x16   :  { %s598_s28 = smov [#allocation7]  }
  0x17   :  { %s40_s29 = sshll.u32 %s598_s28, 4  ;;  %s41_s29 = int_to_ptr.vmem [resolvable:$true] %s40_s29 }
  0x18   :  { %s558_s30 = scalar_lea.vmem %s41_s29, 6144  ;;  %p563_p11 = scmp.lt.s32.totalorder %s41_s29, %s41_s29 }
  0x19   :  { %p559_p10 = scmp.ne.s32.totalorder %s41_s29, %s558_s30  ;;  %p564_p12 = scmp.lt.s32.totalorder %s558_s30, %s558_s30 }
  0x1b   :  { %p565_p13 = por %p564_p12, %p563_p11 }
  0x1d   :  { %p566_p0 = pnand %p565_p13, %p559_p10 }
  0x1f   :  { %569 = shalt.err (!%p566_p0)
}
  0x20   :  { %s599_s1 = smov 128   ;;  %s600_s6 = smov 8  }
  0x21   :  { %46 = dma.hbm_to_vmem [thread:$0]  %s709_s3, 6144, %s41_s29, [#allocation6], %s599_s1, %s599_s1, %s600_s6  }
  0x22   :  { %590 = dma.done.wait [#allocation3], 32  }
  0x23   :  { %591 = vsyncadd [#allocation3], 4294967264 }
  0x24   :  { %592 = dma.done.wait [#allocation6], 6176  }
  0x25   :  { %593 = vsyncadd [#allocation6], 4294961120  ;;  %v601_v0 = vmov 0.0   ;;  %vm602_vm0 = vmmov 0   ;;  %v89_v1 = vld [vmem:[#allocation7 + $0xf8] sm:$0xff]  ;;  %v88_v3 = vld [vmem:[#allocation7 + $0xf0] sm:$0xff] }
  0x26   :  { %397 = vmatprep.subr.mxu0 %v601_v0  ;;  %432 = vmatprep.subr.mxu1 %v601_v0  ;;  %v73_v2 = vld [vmem:[#allocation7 + $0x78] sm:$0xff]  ;;  %v72_v4 = vld [vmem:[#allocation7 + $0x70] sm:$0xff]  ;;  %v87_v5 = vld [vmem:[#allocation7 + $0xe8] sm:$0xff]  ;;  %s603_s11 = smov [#allocation8]  }
  0x27   :  { %429 = vmatprep.mubr.msk.f32.mxu0 %vm602_vm0, %v601_v0  ;;  %464 = vmatprep.mubr.msk.f32.mxu1 %vm602_vm0, %v601_v0  ;;  %v71_v6 = vld [vmem:[#allocation7 + $0x68] sm:$0xff]  ;;  %v86_v7 = vld [vmem:[#allocation7 + $0xe0] sm:$0xff]  ;;  %v85_v9 = vld [vmem:[#allocation7 + $0xd8] sm:$0xff]  ;;  %s335_s12 = sshll.u32 %s603_s11, 4  ;;  %s336_s12 = int_to_ptr.vmem [resolvable:$true] %s335_s12 }
  0x28   :  { %398 = vmatpush3.msra.mxu0 %v89_v1  ;;  %433 = vmatpush3.msra.mxu1 %v73_v2  ;;  %v70_v8 = vld [vmem:[#allocation7 + $0x60] sm:$0xff]  ;;  %v69_v10 = vld [vmem:[#allocation7 + $0x58] sm:$0xff]  ;;  %v84_v11 = vld [vmem:[#allocation7 + $0xd0] sm:$0xff]  ;;  %p575_p2 = scmp.lt.s32.totalorder %s336_s12, %s336_s12 }
  0x29   :  { %399 = vmatprep.subr.mxu0 %v601_v0  ;;  %434 = vmatprep.subr.mxu1 %v601_v0  ;;  %v68_v12 = vld [vmem:[#allocation7 + $0x50] sm:$0xff]  ;;  %v83_v13 = vld [vmem:[#allocation7 + $0xc8] sm:$0xff]  ;;  %v82_v15 = vld [vmem:[#allocation7 + $0xc0] sm:$0xff] }
  0x2a   :  { %400 = vmatpush3.msra.mxu0 %v88_v3  ;;  %435 = vmatpush3.msra.mxu1 %v72_v4  ;;  %v67_v14 = vld [vmem:[#allocation7 + $0x48] sm:$0xff]  ;;  %v66_v16 = vld [vmem:[#allocation7 + $0x40] sm:$0xff]  ;;  %v81_v17 = vld [vmem:[#allocation7 + $0xb8] sm:$0xff] }
  0x2b   :  { %401 = vmatprep.subr.mxu0 %v601_v0  ;;  %436 = vmatprep.subr.mxu1 %v601_v0  ;;  %v65_v18 = vld [vmem:[#allocation7 + $0x38] sm:$0xff]  ;;  %v80_v19 = vld [vmem:[#allocation7 + $0xb0] sm:$0xff]  ;;  %v79_v21 = vld [vmem:[#allocation7 + $0xa8] sm:$0xff] }
  0x2c   :  { %402 = vmatpush3.msra.mxu0 %v87_v5  ;;  %437 = vmatpush3.msra.mxu1 %v71_v6  ;;  %v64_v20 = vld [vmem:[#allocation7 + $0x30] sm:$0xff]  ;;  %v63_v22 = vld [vmem:[#allocation7 + $0x28] sm:$0xff]  ;;  %v78_v23 = vld [vmem:[#allocation7 + $0xa0] sm:$0xff] }
  0x2d   :  { %403 = vmatprep.subr.mxu0 %v601_v0  ;;  %438 = vmatprep.subr.mxu1 %v601_v0  ;;  %v62_v24 = vld [vmem:[#allocation7 + $0x20] sm:$0xff]  ;;  %v77_v25 = vld [vmem:[#allocation7 + $0x98] sm:$0xff]  ;;  %v76_v27 = vld [vmem:[#allocation7 + $0x90] sm:$0xff] }
  0x2e   :  { %404 = vmatpush3.msra.mxu0 %v86_v7  ;;  %439 = vmatpush3.msra.mxu1 %v70_v8  ;;  %v61_v26 = vld [vmem:[#allocation7 + $0x18] sm:$0xff]  ;;  %v60_v28 = vld [vmem:[#allocation7 + $0x10] sm:$0xff]  ;;  %v75_v29 = vld [vmem:[#allocation7 + $0x88] sm:$0xff] }
  0x2f   :  { %405 = vmatprep.subr.mxu0 %v601_v0  ;;  %440 = vmatprep.subr.mxu1 %v601_v0  ;;  %v59_v30 = vld [vmem:[#allocation7 + $0x8] sm:$0xff]  ;;  %v74_v31 = vld [vmem:[#allocation7 + $0x80] sm:$0xff]  ;;  %v107_v33 = vld [vmem:[#allocation5] sm:$0x3] }
  0x30   :  { %406 = vmatpush3.msra.mxu0 %v85_v9  ;;  %441 = vmatpush3.msra.mxu1 %v69_v10  ;;  %v58_v32 = vld [vmem:[#allocation7] sm:$0xff]  ;;  %v106_v34 = vld [vmem:[#allocation2] sm:$0x3]  ;;  %v104_v36 = vld [vmem:[#allocation7 + $0x170] sm:$0xff] }
  0x31   :  { %407 = vmatprep.subr.mxu0 %v601_v0  ;;  %442 = vmatprep.subr.mxu1 %v601_v0  ;;  %v105_v35 = vld [vmem:[#allocation7 + $0x178] sm:$0xff]  ;;  %v103_v37 = vld [vmem:[#allocation7 + $0x168] sm:$0xff]  ;;  %v102_v38 = vld [vmem:[#allocation7 + $0x160] sm:$0xff] }
  0x32   :  { %408 = vmatpush3.msra.mxu0 %v84_v11  ;;  %443 = vmatpush3.msra.mxu1 %v68_v12  ;;  %v101_v39 = vld [vmem:[#allocation7 + $0x158] sm:$0xff]  ;;  %v100_v40 = vld [vmem:[#allocation7 + $0x150] sm:$0xff]  ;;  %v99_v41 = vld [vmem:[#allocation7 + $0x148] sm:$0xff] }
  0x33   :  { %409 = vmatprep.subr.mxu0 %v601_v0  ;;  %444 = vmatprep.subr.mxu1 %v601_v0  ;;  %v98_v42 = vld [vmem:[#allocation7 + $0x140] sm:$0xff]  ;;  %v97_v43 = vld [vmem:[#allocation7 + $0x138] sm:$0xff]  ;;  %v96_v44 = vld [vmem:[#allocation7 + $0x130] sm:$0xff] }
  0x34   :  { %410 = vmatpush3.msra.mxu0 %v83_v13  ;;  %445 = vmatpush3.msra.mxu1 %v67_v14  ;;  %v95_v45 = vld [vmem:[#allocation7 + $0x128] sm:$0xff]  ;;  %v94_v46 = vld [vmem:[#allocation7 + $0x120] sm:$0xff]  ;;  %v93_v47 = vld [vmem:[#allocation7 + $0x118] sm:$0xff] }
  0x35   :  { %411 = vmatprep.subr.mxu0 %v601_v0  ;;  %446 = vmatprep.subr.mxu1 %v601_v0  ;;  %v92_v48 = vld [vmem:[#allocation7 + $0x110] sm:$0xff]  ;;  %v91_v49 = vld [vmem:[#allocation7 + $0x108] sm:$0xff]  ;;  %v90_v50 = vld [vmem:[#allocation7 + $0x100] sm:$0xff] }
  0x36   :  { %412 = vmatpush3.msra.mxu0 %v82_v15  ;;  %447 = vmatpush3.msra.mxu1 %v66_v16  ;;  %v248_v51 = vld [vmem:[%s708_s2] sm:$0x3]  ;;  %s570_s2 = scalar_lea.vmem %s336_s12, 32 }
  0x37   :  { %413 = vmatprep.subr.mxu0 %v601_v0  ;;  %448 = vmatprep.subr.mxu1 %v601_v0  ;;  %v345_v58 = vld [vmem:[%s710_s4] ss:$0 sm:$0xff]  ;;  %p571_p1 = scmp.ne.s32.totalorder %s336_s12, %s570_s2  ;;  %p576_p3 = scmp.lt.s32.totalorder %s570_s2, %s570_s2 }
  0x38   :  { %414 = vmatpush3.msra.mxu0 %v81_v17  ;;  %449 = vmatpush3.msra.mxu1 %v65_v18 }
  0x39   :  { %415 = vmatprep.subr.mxu0 %v601_v0  ;;  %450 = vmatprep.subr.mxu1 %v601_v0  ;;  %p577_p4 = por %p576_p3, %p575_p2 }
  0x3a   :  { %416 = vmatpush3.msra.mxu0 %v80_v19  ;;  %451 = vmatpush3.msra.mxu1 %v64_v20 }
  0x3b   :  { %417 = vmatprep.subr.mxu0 %v601_v0  ;;  %452 = vmatprep.subr.mxu1 %v601_v0  ;;  %p578_p5 = pnand %p577_p4, %p571_p1 }
  0x3c   :  { %418 = vmatpush3.msra.mxu0 %v79_v21  ;;  %453 = vmatpush3.msra.mxu1 %v63_v22 }
  0x3d   :  { %419 = vmatprep.subr.mxu0 %v601_v0  ;;  %454 = vmatprep.subr.mxu1 %v601_v0 }
  0x3e   :  { %420 = vmatpush3.msra.mxu0 %v78_v23  ;;  %455 = vmatpush3.msra.mxu1 %v62_v24 }
  0x3f   :  { %421 = vmatprep.subr.mxu0 %v601_v0  ;;  %456 = vmatprep.subr.mxu1 %v601_v0 }
  0x40   :  { %422 = vmatpush3.msra.mxu0 %v77_v25  ;;  %457 = vmatpush3.msra.mxu1 %v61_v26 }
  0x41   :  { %423 = vmatprep.subr.mxu0 %v601_v0  ;;  %458 = vmatprep.subr.mxu1 %v601_v0 }
  0x42   :  { %424 = vmatpush3.msra.mxu0 %v76_v27  ;;  %459 = vmatpush3.msra.mxu1 %v60_v28 }
  0x43   :  { %425 = vmatprep.subr.mxu0 %v601_v0  ;;  %460 = vmatprep.subr.mxu1 %v601_v0 }
  0x44   :  { %426 = vmatpush3.msra.mxu0 %v75_v29  ;;  %461 = vmatpush3.msra.mxu1 %v59_v30 }
  0x45   :  { %427 = vmatprep.subr.mxu0 %v601_v0  ;;  %462 = vmatprep.subr.mxu1 %v601_v0 }
  0x46   :  { %428 = vmatpush3.msra.mxu0 %v74_v31  ;;  %463 = vmatpush3.msra.mxu1 %v58_v32 }
  0x47   :  { %430 = vmatmul.mubr.f32.vlgmr.msra.gmra.mxu0 %v107_v33  ;;  %467 = vmatprep.subr.mxu0 %v601_v0 }
  0x48   :  { %465 = vmatmul.mubr.f32.vlgmr.msra.gmra.mxu1 %v106_v34  ;;  %468 = vmatpush3.msra.mxu0 %v105_v35 }
  0x49   :  { %469 = vmatprep.subr.mxu0 %v601_v0  ;;  %499 = vmatprep.mubr.msk.f32.mxu0 %vm602_vm0, %v601_v0 }
  0x4a   :  { %470 = vmatpush3.msra.mxu0 %v104_v36 }
  0x4b   :  { %471 = vmatprep.subr.mxu0 %v601_v0 }
  0x4c   :  { %472 = vmatpush3.msra.mxu0 %v103_v37 }
  0x4d   :  { %473 = vmatprep.subr.mxu0 %v601_v0 }
  0x4e   :  { %474 = vmatpush3.msra.mxu0 %v102_v38 }
  0x4f   :  { %475 = vmatprep.subr.mxu0 %v601_v0 }
  0x50   :  { %476 = vmatpush3.msra.mxu0 %v101_v39 }
  0x51   :  { %477 = vmatprep.subr.mxu0 %v601_v0 }
  0x52   :  { %478 = vmatpush3.msra.mxu0 %v100_v40 }
  0x53   :  { %479 = vmatprep.subr.mxu0 %v601_v0 }
  0x54   :  { %480 = vmatpush3.msra.mxu0 %v99_v41 }
  0x55   :  { %481 = vmatprep.subr.mxu0 %v601_v0 }
  0x56   :  { %482 = vmatpush3.msra.mxu0 %v98_v42 }
  0x57   :  { %483 = vmatprep.subr.mxu0 %v601_v0 }
  0x58   :  { %484 = vmatpush3.msra.mxu0 %v97_v43 }
  0x59   :  { %485 = vmatprep.subr.mxu0 %v601_v0 }
  0x5a   :  { %486 = vmatpush3.msra.mxu0 %v96_v44 }
  0x5b   :  { %487 = vmatprep.subr.mxu0 %v601_v0 }
  0x5c   :  { %488 = vmatpush3.msra.mxu0 %v95_v45 }
  0x5d   :  { %489 = vmatprep.subr.mxu0 %v601_v0 }
  0x5e   :  { %490 = vmatpush3.msra.mxu0 %v94_v46 }
  0x5f   :  { %491 = vmatprep.subr.mxu0 %v601_v0 }
  0x60   :  { %492 = vmatpush3.msra.mxu0 %v93_v47 }
  0x61   :  { %493 = vmatprep.subr.mxu0 %v601_v0 }
  0x62   :  { %494 = vmatpush3.msra.mxu0 %v92_v48 }
  0x63   :  { %495 = vmatprep.subr.mxu0 %v601_v0 }
  0x64   :  { %496 = vmatpush3.msra.mxu0 %v91_v49 }
  0x65   :  { %497 = vmatprep.subr.mxu0 %v601_v0 }
  0x66   :  { %498 = vmatpush3.msra.mxu0 %v90_v50 }
  0x67   :  { %500 = vmatmul.mubr.f32.vlgmr.msra.gmra.mxu0 %v248_v51 }
 0x107   :  { %v174_v52 = vpop.f32.mrf.mxu0 }
 0x108   :  { %v244_v53 = vpop.f32.mrf.mxu1 }
 0x109   :  { %v431_v54 = vpop.f32.mrf.mxu0  ;;  %v245_v56 = vadd.f32 %v244_v53, %v174_v52 }
 0x10a   :  { %v466_v55 = vpop.f32.mrf.mxu1 }
 0x127   :  { %v315_v57 = vpop.f32.mrf.mxu0 }
 0x128   :  { %v319_v59 = vadd.f32 %v315_v57, %v245_v56 }
 0x129   :  { %v501_v60 = vpop.f32.mrf.mxu0 }
 0x12a   :  { %v327_v61 = vadd.f32 %v345_v58, %v319_v59 }
 0x12c   :  { %328 = vst [vmem:[#allocation8] sm:$0x3] %v327_v61 }
 0x12d   :  { %581 = shalt.err (!%p578_p5)
}
 0x12e   :  { %338 = dma.vmem_to_hbm [thread:$0]  %s336_s12, 32, %s711_s5, [#allocation4]  }
 0x12f   :  { %594 = dma.done.wait [#allocation4], 32  }
 0x130   :  { %595 = vsyncadd [#allocation4], 4294967264 }
 0x131   :  { %342 = vsyncpa [#allocation3], 1 }
 0x132   :  { %343 = vsyncpa [#allocation6], 1 }
 0x133   :  { %344 = vsyncpa [#allocation4], 1 }

</bundles_post_ra>
